<compile_context>
chip_gen: v6e
topology: v6e:2x2x1
jax: 0.10.0
libtpu: 0.0.40
codegen_flags: <defaults>
</compile_context>

<pallas_src>
import jax
import jax.numpy as jnp
from jax.experimental import pallas as pl
from jax.experimental.pallas import tpu as pltpu

# ---- config (matches Encoder(in_sz, embed_sz, hidden_sz, 'LSTM', n_layers, dropout=0.0)) ----
IN_SZ = 16       # vocab size
EMBED_SZ = 32    # embed_sz
HIDDEN_SZ = 32   # hidden_sz  (== embed_sz so per-layer fused weights can be stacked uniformly)
N_LAYERS = 2


def _encoder_kernel(tok_ref, emb_ref, h_ref, c_ref, wcat_ref, bias_ref,
                    out_ref, h_out_ref, c_out_ref):
    """Whole forward (embedding gather + all LSTM layers) in a single grid step."""
    H = HIDDEN_SZ

    # Embedding row gather inside the kernel (token scalar lives in SMEM via scalar prefetch).
    tok = tok_ref[0]
    x = emb_ref[pl.ds(tok, 1), :]                         # (1, E)

    # Layers are strictly sequential; L is a tiny static constant -> unroll in Python.
    for layer in range(N_LAYERS):
        h_prev = h_ref[layer]                             # (1, H)
        c_prev = c_ref[layer]                             # (1, H)

        xh = jnp.concatenate([x, h_prev], axis=-1)        # (1, E+H)
        gates = (jnp.dot(xh, wcat_ref[layer],
                         preferred_element_type=jnp.float32)
                 + bias_ref[layer])                       # (1, 4H)

        # One full-width sigmoid (lane-dense), tanh only on the g slice.
        sig = jax.nn.sigmoid(gates)
        i_g = sig[:, 0 * H:1 * H]
        f_g = sig[:, 1 * H:2 * H]
        o_g = sig[:, 3 * H:4 * H]
        g_g = jnp.tanh(gates[:, 2 * H:3 * H])

        c_new = f_g * c_prev + i_g * g_g                  # (1, H)
        h_new = o_g * jnp.tanh(c_new)                     # (1, H)

        h_out_ref[layer] = h_new
        c_out_ref[layer] = c_new
        x = h_new                                         # feed next layer

    out_ref[0] = x                                        # output = last layer's hidden


def encoder_forward(packed, token, hidden, cell):
    """token: int32 scalar index; hidden, cell: (n_layers, 1, H) f32."""
    E, H, L, V = EMBED_SZ, HIDDEN_SZ, N_LAYERS, IN_SZ
    token_arr = jnp.asarray(token, jnp.int32).reshape(1)

    out, h_new, c_new = pl.pallas_call(
        _encoder_kernel,
        out_shape=(
            jax.ShapeDtypeStruct((1, 1, H), jnp.float32),   # output (seq=1, batch=1, H)
            jax.ShapeDtypeStruct((L, 1, H), jnp.float32),   # hidden
            jax.ShapeDtypeStruct((L, 1, H), jnp.float32),   # cell
        ),
        grid_spec=pltpu.PrefetchScalarGridSpec(
            num_scalar_prefetch=1,                           # token -> SMEM
            grid=(1,),                                       # single invocation, no tiling
            in_specs=[
                pl.BlockSpec((V, E), lambda i, tok: (0, 0)),               # embedding table
                pl.BlockSpec((L, 1, H), lambda i, tok: (0, 0, 0)),         # h0 (all layers)
                pl.BlockSpec((L, 1, H), lambda i, tok: (0, 0, 0)),         # c0 (all layers)
                pl.BlockSpec((L, E + H, 4 * H), lambda i, tok: (0, 0, 0)), # fused [W_ih^T;W_hh^T]
                pl.BlockSpec((L, 1, 4 * H), lambda i, tok: (0, 0, 0)),     # fused bias
            ],
            out_specs=[
                pl.BlockSpec((1, 1, H), lambda i, tok: (0, 0, 0)),
                pl.BlockSpec((L, 1, H), lambda i, tok: (0, 0, 0)),
                pl.BlockSpec((L, 1, H), lambda i, tok: (0, 0, 0)),
            ],
        ),
        compiler_params=pltpu.CompilerParams(
            dimension_semantics=("arbitrary",)),             # layer chain is sequential
    )(token_arr, packed["embedding"], hidden, cell, packed["w_cat"], packed["bias"])

    return out, h_new, c_new


def init_params(key):
    """Deterministic init mirroring nn.Embedding / nn.LSTM parameter shapes (PyTorch layout)."""
    E, H, L, V = EMBED_SZ, HIDDEN_SZ, N_LAYERS, IN_SZ
    assert E == H, "stacked per-layer fused weights require embed_sz == hidden_sz"
    k = 1.0 / jnp.sqrt(H)
    keys = jax.random.split(key, 5)
    return {
        "embedding": jax.random.normal(keys[0], (V, E), jnp.float32),
        "w_ih": jax.random.uniform(keys[1], (L, 4 * H, E), jnp.float32, -k, k),
        "w_hh": jax.random.uniform(keys[2], (L, 4 * H, H), jnp.float32, -k, k),
        "b_ih": jax.random.uniform(keys[3], (L, 4 * H), jnp.float32, -k, k),
        "b_hh": jax.random.uniform(keys[4], (L, 4 * H), jnp.float32, -k, k),
    }


def pack_params(params):
    """One-time fusion: W_cat = [W_ih^T ; W_hh^T] per layer, bias = b_ih + b_hh."""
    w_cat = jnp.concatenate(
        [jnp.transpose(params["w_ih"], (0, 2, 1)),    # (L, E, 4H)
         jnp.transpose(params["w_hh"], (0, 2, 1))],   # (L, H, 4H)
        axis=1)                                       # (L, E+H, 4H)
    bias = (params["b_ih"] + params["b_hh"])[:, None, :]   # (L, 1, 4H)
    return {"embedding": params["embedding"], "w_cat": w_cat, "bias": bias}


def reference_forward(params, token, hidden, cell):
    """Pure-JAX reference of the same math (PyTorch LSTM cell semantics)."""
    E, H, L = EMBED_SZ, HIDDEN_SZ, N_LAYERS
    x = params["embedding"][token].reshape(1, E)
    hs, cs = [], []
    for l in range(L):
        gates = (x @ params["w_ih"][l].T + hidden[l] @ params["w_hh"][l].T
                 + params["b_ih"][l] + params["b_hh"][l])
        i = jax.nn.sigmoid(gates[:, 0 * H:1 * H])
        f = jax.nn.sigmoid(gates[:, 1 * H:2 * H])
        g = jnp.tanh(gates[:, 2 * H:3 * H])
        o = jax.nn.sigmoid(gates[:, 3 * H:4 * H])
        c = f * cell[l] + i * g
        h = o * jnp.tanh(c)
        hs.append(h); cs.append(c)
        x = h
    return x.reshape(1, 1, H), jnp.stack(hs), jnp.stack(cs)


if __name__ == "__main__":
    key = jax.random.PRNGKey(0)
    params = init_params(key)
    packed = pack_params(params)

    token = jnp.int32(3)                                        # single input token index
    hidden0 = jnp.zeros((N_LAYERS, 1, HIDDEN_SZ), jnp.float32)  # Encoder.initHidden()
    cell0 = jnp.zeros((N_LAYERS, 1, HIDDEN_SZ), jnp.float32)

    out, h_new, c_new = jax.jit(encoder_forward)(packed, token, hidden0, cell0)
    jax.block_until_ready((out, h_new, c_new))

    # sanity check against pure-JAX reference (unfused PyTorch-layout params)
    ref_out, ref_h, ref_c = reference_forward(params, token, hidden0, cell0)
    assert jnp.allclose(out, ref_out, atol=1e-5)
    assert jnp.allclose(h_new, ref_h, atol=1e-5)
    assert jnp.allclose(c_new, ref_c, atol=1e-5)

    print("KERNEL_OK")
</pallas_src>

<mosaic_0001>
module attributes {stable_mosaic.version = 11 : i64} {
  func.func @_encoder_kernel(%arg0: i32, %arg1: memref<1xi32, #tpu.memory_space<smem>>, %arg2: memref<16x32xf32, #tpu.memory_space<vmem>>, %arg3: memref<2x1x32xf32, #tpu.memory_space<vmem>>, %arg4: memref<2x1x32xf32, #tpu.memory_space<vmem>>, %arg5: memref<2x64x128xf32, #tpu.memory_space<vmem>>, %arg6: memref<2x1x128xf32, #tpu.memory_space<vmem>>, %arg7: memref<1x1x32xf32, #tpu.memory_space<vmem>>, %arg8: memref<2x1x32xf32, #tpu.memory_space<vmem>>, %arg9: memref<2x1x32xf32, #tpu.memory_space<vmem>>) attributes {dimension_semantics = [#tpu.dimension_semantics<arbitrary>], iteration_bounds = array<i64: 1>, scalar_prefetch = 1 : i64, scratch_operands = 0 : i64, tpu.core_type = #tpu.core_type<tc>, window_params = [{pipeline_mode = #tpu.pipeline_mode<synchronous>, transform_indices = @transform_0, window_bounds = array<i64: 16, 32>}, {pipeline_mode = #tpu.pipeline_mode<synchronous>, transform_indices = @transform_1, window_bounds = array<i64: 2, 1, 32>}, {pipeline_mode = #tpu.pipeline_mode<synchronous>, transform_indices = @transform_2, window_bounds = array<i64: 2, 1, 32>}, {pipeline_mode = #tpu.pipeline_mode<synchronous>, transform_indices = @transform_3, window_bounds = array<i64: 2, 64, 128>}, {pipeline_mode = #tpu.pipeline_mode<synchronous>, transform_indices = @transform_4, window_bounds = array<i64: 2, 1, 128>}, {pipeline_mode = #tpu.pipeline_mode<synchronous>, transform_indices = @transform_5, window_bounds = array<i64: 1, 1, 32>}, {pipeline_mode = #tpu.pipeline_mode<synchronous>, transform_indices = @transform_6, window_bounds = array<i64: 2, 1, 32>}, {pipeline_mode = #tpu.pipeline_mode<synchronous>, transform_indices = @transform_7, window_bounds = array<i64: 2, 1, 32>}]} {
    %c0 = arith.constant 0 : index
    %0 = memref.load %arg1[%c0] : memref<1xi32, #tpu.memory_space<smem>>
    %1 = arith.index_cast %0 : i32 to index
    %c0_0 = arith.constant 0 : index
    %2 = vector.load %arg2[%1, %c0_0] : memref<16x32xf32, #tpu.memory_space<vmem>>, vector<1x32xf32>
    %c0_1 = arith.constant 0 : index
    %c0_2 = arith.constant 0 : index
    %c0_3 = arith.constant 0 : index
    %3 = vector.load %arg3[%c0_1, %c0_2, %c0_3] : memref<2x1x32xf32, #tpu.memory_space<vmem>>, vector<1x1x32xf32>
    %4 = vector.shape_cast %3 : vector<1x1x32xf32> to vector<1x32xf32>
    %c0_4 = arith.constant 0 : index
    %c0_5 = arith.constant 0 : index
    %c0_6 = arith.constant 0 : index
    %5 = vector.load %arg4[%c0_4, %c0_5, %c0_6] : memref<2x1x32xf32, #tpu.memory_space<vmem>>, vector<1x1x32xf32>
    %6 = vector.shape_cast %5 : vector<1x1x32xf32> to vector<1x32xf32>
    %7 = tpu.concatenate %2, %4 in 1 : vector<1x32xf32>, vector<1x32xf32> -> vector<1x64xf32>
    %c0_7 = arith.constant 0 : index
    %c0_8 = arith.constant 0 : index
    %c0_9 = arith.constant 0 : index
    %8 = vector.load %arg5[%c0_7, %c0_8, %c0_9] : memref<2x64x128xf32, #tpu.memory_space<vmem>>, vector<1x64x128xf32>
    %9 = vector.shape_cast %8 : vector<1x64x128xf32> to vector<64x128xf32>
    %cst = arith.constant dense<0.000000e+00> : vector<1x128xf32>
    %10 = tpu.matmul %7, %9, %cst {dimension_numbers = #tpu.dot_dimension_numbers<[1], [0], [0], [1], [0, 0, 1, 1], [], []>} : vector<1x64xf32>, vector<64x128xf32>, vector<1x128xf32> -> vector<1x128xf32>
    %c0_10 = arith.constant 0 : index
    %c0_11 = arith.constant 0 : index
    %c0_12 = arith.constant 0 : index
    %11 = vector.load %arg6[%c0_10, %c0_11, %c0_12] : memref<2x1x128xf32, #tpu.memory_space<vmem>>, vector<1x1x128xf32>
    %12 = vector.shape_cast %11 : vector<1x1x128xf32> to vector<1x128xf32>
    %13 = arith.addf %10, %12 : vector<1x128xf32>
    %14 = arith.negf %13 : vector<1x128xf32>
    %15 = math.exp %14 : vector<1x128xf32>
    %cst_13 = arith.constant 1.000000e+00 : f32
    %16 = vector.broadcast %cst_13 : f32 to vector<1x128xf32>
    %17 = arith.addf %16, %15 : vector<1x128xf32>
    %18 = arith.divf %16, %17 : vector<1x128xf32>
    %19 = vector.extract_strided_slice %18 {offsets = [0, 0], sizes = [1, 32], strides = [1, 1]} : vector<1x128xf32> to vector<1x32xf32>
    %20 = vector.extract_strided_slice %18 {offsets = [0, 32], sizes = [1, 32], strides = [1, 1]} : vector<1x128xf32> to vector<1x32xf32>
    %21 = vector.extract_strided_slice %18 {offsets = [0, 96], sizes = [1, 32], strides = [1, 1]} : vector<1x128xf32> to vector<1x32xf32>
    %22 = vector.extract_strided_slice %13 {offsets = [0, 64], sizes = [1, 32], strides = [1, 1]} : vector<1x128xf32> to vector<1x32xf32>
    %23 = math.tanh %22 : vector<1x32xf32>
    %24 = arith.mulf %20, %6 : vector<1x32xf32>
    %25 = arith.mulf %19, %23 : vector<1x32xf32>
    %26 = arith.addf %24, %25 : vector<1x32xf32>
    %27 = math.tanh %26 : vector<1x32xf32>
    %28 = arith.mulf %21, %27 : vector<1x32xf32>
    %c0_14 = arith.constant 0 : index
    %c0_15 = arith.constant 0 : index
    %c0_16 = arith.constant 0 : index
    %29 = vector.load %arg8[%c0_14, %c0_15, %c0_16] : memref<2x1x32xf32, #tpu.memory_space<vmem>>, vector<1x1x32xf32>
    %30 = vector.shape_cast %29 : vector<1x1x32xf32> to vector<1x32xf32>
    %31 = vector.shape_cast %28 : vector<1x32xf32> to vector<1x1x32xf32>
    tpu.vector_store %arg8[%c0_14, %c0_15, %c0_16], %31 {strides = array<i32>} : memref<2x1x32xf32, #tpu.memory_space<vmem>>, vector<1x1x32xf32>,
    %c0_17 = arith.constant 0 : index
    %c0_18 = arith.constant 0 : index
    %c0_19 = arith.constant 0 : index
    %32 = vector.load %arg9[%c0_17, %c0_18, %c0_19] : memref<2x1x32xf32, #tpu.memory_space<vmem>>, vector<1x1x32xf32>
    %33 = vector.shape_cast %32 : vector<1x1x32xf32> to vector<1x32xf32>
    %34 = vector.shape_cast %26 : vector<1x32xf32> to vector<1x1x32xf32>
    tpu.vector_store %arg9[%c0_17, %c0_18, %c0_19], %34 {strides = array<i32>} : memref<2x1x32xf32, #tpu.memory_space<vmem>>, vector<1x1x32xf32>,
    %c1 = arith.constant 1 : index
    %c0_20 = arith.constant 0 : index
    %c0_21 = arith.constant 0 : index
    %35 = vector.load %arg3[%c1, %c0_20, %c0_21] : memref<2x1x32xf32, #tpu.memory_space<vmem>>, vector<1x1x32xf32>
    %36 = vector.shape_cast %35 : vector<1x1x32xf32> to vector<1x32xf32>
    %c1_22 = arith.constant 1 : index
    %c0_23 = arith.constant 0 : index
    %c0_24 = arith.constant 0 : index
    %37 = vector.load %arg4[%c1_22, %c0_23, %c0_24] : memref<2x1x32xf32, #tpu.memory_space<vmem>>, vector<1x1x32xf32>
    %38 = vector.shape_cast %37 : vector<1x1x32xf32> to vector<1x32xf32>
    %39 = tpu.concatenate %28, %36 in 1 : vector<1x32xf32>, vector<1x32xf32> -> vector<1x64xf32>
    %c1_25 = arith.constant 1 : index
    %c0_26 = arith.constant 0 : index
    %c0_27 = arith.constant 0 : index
    %40 = vector.load %arg5[%c1_25, %c0_26, %c0_27] : memref<2x64x128xf32, #tpu.memory_space<vmem>>, vector<1x64x128xf32>
    %41 = vector.shape_cast %40 : vector<1x64x128xf32> to vector<64x128xf32>
    %cst_28 = arith.constant dense<0.000000e+00> : vector<1x128xf32>
    %42 = tpu.matmul %39, %41, %cst_28 {dimension_numbers = #tpu.dot_dimension_numbers<[1], [0], [0], [1], [0, 0, 1, 1], [], []>} : vector<1x64xf32>, vector<64x128xf32>, vector<1x128xf32> -> vector<1x128xf32>
    %c1_29 = arith.constant 1 : index
    %c0_30 = arith.constant 0 : index
    %c0_31 = arith.constant 0 : index
    %43 = vector.load %arg6[%c1_29, %c0_30, %c0_31] : memref<2x1x128xf32, #tpu.memory_space<vmem>>, vector<1x1x128xf32>
    %44 = vector.shape_cast %43 : vector<1x1x128xf32> to vector<1x128xf32>
    %45 = arith.addf %42, %44 : vector<1x128xf32>
    %46 = arith.negf %45 : vector<1x128xf32>
    %47 = math.exp %46 : vector<1x128xf32>
    %cst_32 = arith.constant 1.000000e+00 : f32
    %48 = vector.broadcast %cst_32 : f32 to vector<1x128xf32>
    %49 = arith.addf %48, %47 : vector<1x128xf32>
    %50 = arith.divf %48, %49 : vector<1x128xf32>
    %51 = vector.extract_strided_slice %50 {offsets = [0, 0], sizes = [1, 32], strides = [1, 1]} : vector<1x128xf32> to vector<1x32xf32>
    %52 = vector.extract_strided_slice %50 {offsets = [0, 32], sizes = [1, 32], strides = [1, 1]} : vector<1x128xf32> to vector<1x32xf32>
    %53 = vector.extract_strided_slice %50 {offsets = [0, 96], sizes = [1, 32], strides = [1, 1]} : vector<1x128xf32> to vector<1x32xf32>
    %54 = vector.extract_strided_slice %45 {offsets = [0, 64], sizes = [1, 32], strides = [1, 1]} : vector<1x128xf32> to vector<1x32xf32>
    %55 = math.tanh %54 : vector<1x32xf32>
    %56 = arith.mulf %52, %38 : vector<1x32xf32>
    %57 = arith.mulf %51, %55 : vector<1x32xf32>
    %58 = arith.addf %56, %57 : vector<1x32xf32>
    %59 = math.tanh %58 : vector<1x32xf32>
    %60 = arith.mulf %53, %59 : vector<1x32xf32>
    %c1_33 = arith.constant 1 : index
    %c0_34 = arith.constant 0 : index
    %c0_35 = arith.constant 0 : index
    %61 = vector.load %arg8[%c1_33, %c0_34, %c0_35] : memref<2x1x32xf32, #tpu.memory_space<vmem>>, vector<1x1x32xf32>
    %62 = vector.shape_cast %61 : vector<1x1x32xf32> to vector<1x32xf32>
    %63 = vector.shape_cast %60 : vector<1x32xf32> to vector<1x1x32xf32>
    tpu.vector_store %arg8[%c1_33, %c0_34, %c0_35], %63 {strides = array<i32>} : memref<2x1x32xf32, #tpu.memory_space<vmem>>, vector<1x1x32xf32>,
    %c1_36 = arith.constant 1 : index
    %c0_37 = arith.constant 0 : index
    %c0_38 = arith.constant 0 : index
    %64 = vector.load %arg9[%c1_36, %c0_37, %c0_38] : memref<2x1x32xf32, #tpu.memory_space<vmem>>, vector<1x1x32xf32>
    %65 = vector.shape_cast %64 : vector<1x1x32xf32> to vector<1x32xf32>
    %66 = vector.shape_cast %58 : vector<1x32xf32> to vector<1x1x32xf32>
    tpu.vector_store %arg9[%c1_36, %c0_37, %c0_38], %66 {strides = array<i32>} : memref<2x1x32xf32, #tpu.memory_space<vmem>>, vector<1x1x32xf32>,
    %c0_39 = arith.constant 0 : index
    %c0_40 = arith.constant 0 : index
    %c0_41 = arith.constant 0 : index
    %67 = vector.load %arg7[%c0_39, %c0_40, %c0_41] : memref<1x1x32xf32, #tpu.memory_space<vmem>>, vector<1x1x32xf32>
    %68 = vector.shape_cast %67 : vector<1x1x32xf32> to vector<1x32xf32>
    %69 = vector.shape_cast %60 : vector<1x32xf32> to vector<1x1x32xf32>
    tpu.vector_store %arg7[%c0_39, %c0_40, %c0_41], %69 {strides = array<i32>} : memref<1x1x32xf32, #tpu.memory_space<vmem>>, vector<1x1x32xf32>,
    return
  }
  func.func @transform_0(%arg0: i32, %arg1: memref<1xi32, #tpu.memory_space<smem>>) -> (i32, i32) {
    %c0_i32 = arith.constant 0 : i32
    %c0_i32_0 = arith.constant 0 : i32
    %c0_i32_1 = arith.constant 0 : i32
    return %c0_i32, %c0_i32_0 : i32, i32
  }
  func.func @transform_1(%arg0: i32, %arg1: memref<1xi32, #tpu.memory_space<smem>>) -> (i32, i32, i32) {
    %c0_i32 = arith.constant 0 : i32
    %c0_i32_0 = arith.constant 0 : i32
    %c0_i32_1 = arith.constant 0 : i32
    %c0_i32_2 = arith.constant 0 : i32
    return %c0_i32, %c0_i32_0, %c0_i32_1 : i32, i32, i32
  }
  func.func @transform_2(%arg0: i32, %arg1: memref<1xi32, #tpu.memory_space<smem>>) -> (i32, i32, i32) {
    %c0_i32 = arith.constant 0 : i32
    %c0_i32_0 = arith.constant 0 : i32
    %c0_i32_1 = arith.constant 0 : i32
    %c0_i32_2 = arith.constant 0 : i32
    return %c0_i32, %c0_i32_0, %c0_i32_1 : i32, i32, i32
  }
  func.func @transform_3(%arg0: i32, %arg1: memref<1xi32, #tpu.memory_space<smem>>) -> (i32, i32, i32) {
    %c0_i32 = arith.constant 0 : i32
    %c0_i32_0 = arith.constant 0 : i32
    %c0_i32_1 = arith.constant 0 : i32
    %c0_i32_2 = arith.constant 0 : i32
    return %c0_i32, %c0_i32_0, %c0_i32_1 : i32, i32, i32
  }
  func.func @transform_4(%arg0: i32, %arg1: memref<1xi32, #tpu.memory_space<smem>>) -> (i32, i32, i32) {
    %c0_i32 = arith.constant 0 : i32
    %c0_i32_0 = arith.constant 0 : i32
    %c0_i32_1 = arith.constant 0 : i32
    %c0_i32_2 = arith.constant 0 : i32
    return %c0_i32, %c0_i32_0, %c0_i32_1 : i32, i32, i32
  }
  func.func @transform_5(%arg0: i32, %arg1: memref<1xi32, #tpu.memory_space<smem>>) -> (i32, i32, i32) {
    %c0_i32 = arith.constant 0 : i32
    %c0_i32_0 = arith.constant 0 : i32
    %c0_i32_1 = arith.constant 0 : i32
    %c0_i32_2 = arith.constant 0 : i32
    return %c0_i32, %c0_i32_0, %c0_i32_1 : i32, i32, i32
  }
  func.func @transform_6(%arg0: i32, %arg1: memref<1xi32, #tpu.memory_space<smem>>) -> (i32, i32, i32) {
    %c0_i32 = arith.constant 0 : i32
    %c0_i32_0 = arith.constant 0 : i32
    %c0_i32_1 = arith.constant 0 : i32
    %c0_i32_2 = arith.constant 0 : i32
    return %c0_i32, %c0_i32_0, %c0_i32_1 : i32, i32, i32
  }
  func.func @transform_7(%arg0: i32, %arg1: memref<1xi32, #tpu.memory_space<smem>>) -> (i32, i32, i32) {
    %c0_i32 = arith.constant 0 : i32
    %c0_i32_0 = arith.constant 0 : i32
    %c0_i32_1 = arith.constant 0 : i32
    %c0_i32_2 = arith.constant 0 : i32
    return %c0_i32, %c0_i32_0, %c0_i32_1 : i32, i32, i32
  }
}

</mosaic_0001>

<bundles_post_ra>
// kernel: encoder_forward.1
= control target key start
LH: loop header
LB: loop body
LE: loop exit
PB: predicated region body
PF: predicated region fallthrough
CT: control target
= control target key end

     0   :  { %15 = vsyncpa [#allocation5], 0  ;;  %s776_s0 = inlined_call_operand.<no memory space> [shape: s32[1], index: 0, kind: input, shape index: {}]   ;;  %s777_s1 = inlined_call_operand.hbm [shape: f32[16,32], index: 1, kind: input, shape index: {}]   ;;  %s778_s2 = inlined_call_operand.vmem [shape: f32[2,1,32], index: 2, kind: input, shape index: {}]   ;;  %s779_s3 = inlined_call_operand.vmem [shape: f32[2,1,32], index: 3, kind: input, shape index: {}]   ;;  %s780_s4 = inlined_call_operand.hbm [shape: f32[2,64,128], index: 4, kind: input, shape index: {}]   ;;  %s781_s5 = inlined_call_operand.hbm [shape: f32[2,1,128], index: 5, kind: input, shape index: {}]   ;;  %s782_s6 = inlined_call_operand.hbm [shape: f32[1,1,32], index: 6, kind: output, shape index: {0}]   ;;  %s783_s7 = inlined_call_operand.hbm [shape: f32[2,1,32], index: 7, kind: output, shape index: {1}]   ;;  %s784_s8 = inlined_call_operand.hbm [shape: f32[2,1,32], index: 8, kind: output, shape index: {2}]  }
   0x1   :  { %16 = vsyncpa [#allocation8], 0 }
   0x2   :  { %17 = vsyncpa [#allocation6], 0 }
   0x3   :  { %18 = vsyncpa [#allocation12], 0  ;;  %s624_s27 = smov [#allocation7]   ;;  %s625_s29 = smov [#allocation4]  }
   0x4   :  { %s40_s28 = sshll.u32 %s624_s27, 4  ;;  %s24_s30 = sshll.u32 %s625_s29, 4  ;;  %s41_s28 = int_to_ptr.vmem [resolvable:$true] %s40_s28  ;;  %s25_s30 = int_to_ptr.vmem [resolvable:$true] %s24_s30 }
   0x5   :  { %s504_s9 = scalar_lea.vmem %s41_s28, 2048  ;;  %p509_p1 = scmp.lt.s32.totalorder %s41_s28, %s41_s28 }
   0x6   :  { %p505_p0 = scmp.ne.s32.totalorder %s41_s28, %s504_s9  ;;  %p510_p2 = scmp.lt.s32.totalorder %s504_s9, %s504_s9 }
   0x8   :  { %p511_p3 = por %p510_p2, %p509_p1 }
   0xa   :  { %p512_p4 = pnand %p511_p3, %p505_p0 }
   0xc   :  { %515 = shalt.err (!%p512_p4)
}
   0xd   :  { %s626_s10 = smov 128   ;;  %s627_s11 = smov 8  }
   0xe   :  { %46 = dma.hbm_to_vmem [thread:$0]  %s780_s4, 2048, %s41_s28, [#allocation8], %s626_s10, %s626_s10, %s627_s11  }
   0xf   :  { %s524_s14 = scalar_lea.vmem %s25_s30, 256  ;;  %p529_p6 = scmp.lt.s32.totalorder %s25_s30, %s25_s30 }
  0x10   :  { %p525_p5 = scmp.ne.s32.totalorder %s25_s30, %s524_s14  ;;  %p530_p7 = scmp.lt.s32.totalorder %s524_s14, %s524_s14 }
  0x12   :  { %p531_p8 = por %p530_p7, %p529_p6 }
  0x14   :  { %p532_p9 = pnand %p531_p8, %p525_p5 }
  0x16   :  { %535 = shalt.err (!%p532_p9)
}
  0x17   :  { %30 = dma.hbm_to_vmem [thread:$0]  %s777_s1, 256, %s25_s30, [#allocation5], %s626_s10, %s626_s10, %s627_s11  }
  0x18   :  { %s628_s17 = smov [#allocation9]  }
  0x19   :  { %s52_s18 = sshll.u32 %s628_s17, 4  ;;  %s53_s18 = int_to_ptr.vmem [resolvable:$true] %s52_s18 }
  0x1a   :  { %s544_s19 = scalar_lea.vmem %s53_s18, 32  ;;  %p549_p11 = scmp.lt.s32.totalorder %s53_s18, %s53_s18 }
  0x1b   :  { %p545_p10 = scmp.ne.s32.totalorder %s53_s18, %s544_s19  ;;  %p550_p12 = scmp.lt.s32.totalorder %s544_s19, %s544_s19 }
  0x1d   :  { %p551_p13 = por %p550_p12, %p549_p11 }
  0x1f   :  { %p552_p0 = pnand %p551_p13, %p545_p10 }
  0x21   :  { %555 = shalt.err (!%p552_p0)
}
  0x22   :  { %s629_s4 = smov 16   ;;  %s630_s20 = smov 1  }
  0x23   :  { %58 = dma.hbm_to_vmem [thread:$0]  %s781_s5, 32, %s53_s18, [#allocation8], %s629_s4, %s629_s4, %s630_s20  }
  0x24   :  { %616 = dma.done.wait [#allocation5], 256  }
  0x25   :  { %617 = vsyncadd [#allocation5], 4294967040 }
  0x26   :  { %618 = dma.done.wait [#allocation8], 2080  }
  0x27   :  { %619 = vsyncadd [#allocation8], 4294965216  ;;  %v631_v0 = vmov 0.0   ;;  %vm632_vm0 = vmmov 0   ;;  %v399_v1 = vld [vmem:[%s778_s2] ss:$0 sm:$0xff] }
  0x28   :  { %427 = vmatprep.subr.mxu0 %v631_v0  ;;  %446 = vmatprep.subr.mxu1 %v631_v0  ;;  %v90_v2 = vld [vmem:[#allocation7 + $0x38] sm:$0xff]  ;;  %v89_v3 = vld [vmem:[#allocation7 + $0x30] sm:$0xff]  ;;  %s633_s5 = smov 32   ;;  %v88_v4 = vld [vmem:[#allocation7 + $0x28] sm:$0xff]  ;;  %vm81_vm1 = vcmask 261120   ;;  %s69_s28 = scalar_lea.vmem [#allocation4], %s776_s0 }
  0x29   :  { %443 = vmatprep.mubr.msk.f32.mxu0 %vm632_vm0, %v631_v0  ;;  %462 = vmatprep.mubr.msk.f32.mxu1 %vm632_vm0, %v631_v0  ;;  %v402_v5 = vld [vmem:[%s779_s3] ss:$0 sm:$0xff]  ;;  %v87_v6 = vld [vmem:[#allocation7 + $0x20] sm:$0xff]  ;;  %v86_v7 = vld [vmem:[#allocation7 + $0x18] sm:$0xff]  ;;  %vm92_vm2 = vcmask 523264   ;;  %s634_s29 = smov 64  }
  0x2a   :  { %78 = vrot.lane.b32.xlu0 %v399_v1, %s633_s5  ;;  %428 = vmatpush3.msra.mxu0 %v90_v2  ;;  %v85_v8 = vld [vmem:[#allocation7 + $0x10] sm:$0xff]  ;;  %v84_v9 = vld [vmem:[#allocation7 + $0x8] sm:$0xff]  ;;  %v83_v10 = vld [vmem:[#allocation7] sm:$0xff]  ;;  %vm202_vm3 = vcmask 253952   ;;  %s637_s12 = smov [#allocation10]   ;;  %s638_s14 = smov [#allocation13]  }
  0x2b   :  { %429 = vmatprep.subr.mxu0 %v631_v0  ;;  %178 = vrot.lane.b32.xlu1 %v402_v5, %s633_s5  ;;  %v70_v11 = vld [vmem:[%s69_s28] sm:$0x1]  ;;  %v91_v14 = vld [vmem:[#allocation9] sm:$0x1]  ;;  %v230_v29 = vld [vmem:[#allocation7 + $0x78] sm:$0xff]  ;;  %s357_s13 = sshll.u32 %s637_s12, 4  ;;  %s358_s13 = int_to_ptr.vmem [resolvable:$true] %s357_s13 }
  0x2c   :  { %430 = vmatpush3.msra.mxu0 %v89_v3  ;;  %v229_v30 = vld [vmem:[#allocation7 + $0x70] sm:$0xff]  ;;  %447 = vmatpush3.msra.mxu1 %v230_v29  ;;  %v228_v31 = vld [vmem:[#allocation7 + $0x68] sm:$0xff]  ;;  %v227_v32 = vld [vmem:[#allocation7 + $0x60] sm:$0xff]  ;;  %s378_s15 = sshll.u32 %s638_s14, 4  ;;  %s753_s15 = int_to_ptr.vmem [resolvable:$true] %s378_s15 }
  0x2d   :  { %431 = vmatprep.subr.mxu0 %v631_v0  ;;  %448 = vmatprep.subr.mxu1 %v631_v0  ;;  %v226_v33 = vld [vmem:[#allocation7 + $0x58] sm:$0xff]  ;;  %v225_v34 = vld [vmem:[#allocation7 + $0x50] sm:$0xff]  ;;  %v224_v36 = vld [vmem:[#allocation7 + $0x48] sm:$0xff] }
  0x2e   :  { %432 = vmatpush3.msra.mxu0 %v88_v4  ;;  %449 = vmatpush3.msra.mxu1 %v229_v30  ;;  %v405_v37 = vld [vmem:[%s778_s2 + $0x1] ss:$0 sm:$0xff]  ;;  %v223_v38 = vld [vmem:[#allocation7 + $0x40] sm:$0xff]  ;;  %s635_s2 = smov 96  }
  0x2f   :  { %433 = vmatprep.subr.mxu0 %v631_v0  ;;  %450 = vmatprep.subr.mxu1 %v631_v0  ;;  %v408_v39 = vld [vmem:[%s779_s3 + $0x1] ss:$0 sm:$0xff]  ;;  %v232_v45 = vld [vmem:[#allocation9 + $0x1] sm:$0x1]  ;;  %s636_s3 = smov [#allocation11]  }
  0x30   :  { %434 = vmatpush3.msra.mxu0 %v87_v6  ;;  %451 = vmatpush3.msra.mxu1 %v228_v31  ;;  %s366_s11 = sshll.u32 %s636_s3, 4  ;;  %s367_s11 = int_to_ptr.vmem [resolvable:$true] %s366_s11 }
  0x31   :  { %435 = vmatprep.subr.mxu0 %v631_v0  ;;  %452 = vmatprep.subr.mxu1 %v631_v0  ;;  %s556_s16 = scalar_lea.vmem %s367_s11, 32  ;;  %p561_p2 = scmp.lt.s32.totalorder %s367_s11, %s367_s11 }
  0x32   :  { %436 = vmatpush3.msra.mxu0 %v86_v7  ;;  %453 = vmatpush3.msra.mxu1 %v227_v32  ;;  %p557_p1 = scmp.ne.s32.totalorder %s367_s11, %s556_s16  ;;  %p562_p3 = scmp.lt.s32.totalorder %s556_s16, %s556_s16 }
  0x33   :  { %437 = vmatprep.subr.mxu0 %v631_v0  ;;  %454 = vmatprep.subr.mxu1 %v631_v0 }
  0x34   :  { %438 = vmatpush3.msra.mxu0 %v85_v8  ;;  %455 = vmatpush3.msra.mxu1 %v226_v33  ;;  %p563_p4 = por %p562_p3, %p561_p2 }
  0x35   :  { %439 = vmatprep.subr.mxu0 %v631_v0  ;;  %456 = vmatprep.subr.mxu1 %v631_v0 }
  0x36   :  { %440 = vmatpush3.msra.mxu0 %v84_v9  ;;  %457 = vmatpush3.msra.mxu1 %v225_v34  ;;  %p564_p5 = pnand %p563_p4, %p557_p1 }
  0x37   :  { %441 = vmatprep.subr.mxu0 %v631_v0  ;;  %458 = vmatprep.subr.mxu1 %v631_v0 }
  0x38   :  { %442 = vmatpush3.msra.mxu0 %v83_v10  ;;  %459 = vmatpush3.msra.mxu1 %v224_v36 }
  0x39   :  { %460 = vmatprep.subr.mxu1 %v631_v0 }
  0x3a   :  { %461 = vmatpush3.msra.mxu1 %v223_v38 }
  0x9c   :  { %v79_v12 = vpop.permute.xlu0 %78 }
  0x9d   :  { %v82_v13 = vsel %vm81_vm1, %v70_v11, %v79_v12  ;;  %v179_v25 = vpop.permute.xlu1 %178 }
  0x9e   :  { %444 = vmatmul.mubr.msk.f32.vlgmr.msra.gmra.mxu0 %vm92_vm2, %v82_v13 }
 0x15e   :  { %v162_v15 = vpop.f32.mrf.mxu0 }
 0x15f   :  { %v163_v16 = vadd.f32 %v162_v15, %v91_v14 }
 0x160   :  { %v445_v17 = vpop.f32.mrf.mxu0 }
 0x161   :  { %480 = vtanh.f32 %v163_v16  ;;  %v401_v19 = vmul.f32 -1.442695, %v163_v16 }
 0x163   :  { %482 = vpow2.f32 %v401_v19 }
 0x16e   :  { %v481_v18 = vpop.eup %480 }
 0x16f   :  { %183 = vrot.lane.b32.xlu0 %v481_v18, %s634_s29 }
 0x170   :  { %v483_v20 = vpop.eup %482 }
 0x171   :  { %v169_v21 = vadd.f32 1.0, %v483_v20 }
 0x173   :  { %484 = vrcp.f32 %v169_v21 }
 0x180   :  { %v485_v22 = vpop.eup %484 }
 0x181   :  { %v181_v26 = vmul.f32 %v485_v22, %v179_v25 }
 0x1e1   :  { %v184_v23 = vpop.permute.xlu0 %183 }
 0x1e2   :  { %v186_v24 = vmul.f32 %v485_v22, %v184_v23 }
 0x1e4   :  { %188 = vrot.lane.b32.xlu1 %v186_v24, %s633_s5 }
 0x256   :  { %v189_v27 = vpop.permute.xlu1 %188 }
 0x257   :  { %v722_v28 = vadd.f32 %v189_v27, %v181_v26 }
 0x259   :  { %486 = vtanh.f32 %v722_v28 }
 0x266   :  { %v487_v35 = vpop.eup %486 }
 0x267   :  { %194 = vrot.lane.b32.xlu0 %v487_v35, %s634_s29 }
 0x26b   :  { %218 = vrot.lane.b32.xlu0 %v405_v37, %s633_s5 }
 0x26f   :  { %318 = vrot.lane.b32.xlu0 %v408_v39, %s633_s5 }
 0x2d9   :  { %v195_v40 = vpop.permute.xlu0 %194 }
 0x2da   :  { %v197_v41 = vmul.f32 %v485_v22, %v195_v40 }
 0x2dc   :  { %199 = vrot.lane.b32.xlu1 %v197_v41, %s633_s5 }
 0x2dd   :  { %v219_v42 = vpop.permute.xlu0 %218 }
 0x2e1   :  { %v319_v56 = vpop.permute.xlu0 %318 }
 0x34e   :  { %v200_v43 = vpop.permute.xlu1 %199 }
 0x34f   :  { %203 = vst.msk [vmem:[#allocation11] sm:$0x1] %vm202_vm3, %v200_v43  ;;  %v221_v44 = vsel %vm81_vm1, %v200_v43, %v219_v42 }
 0x350   :  { %463 = vmatmul.mubr.msk.f32.vlgmr.msra.gmra.mxu1 %vm92_vm2, %v221_v44 }
 0x410   :  { %v302_v46 = vpop.f32.mrf.mxu1 }
 0x411   :  { %v303_v47 = vadd.f32 %v302_v46, %v232_v45 }
 0x412   :  { %v464_v48 = vpop.f32.mrf.mxu1 }
 0x413   :  { %488 = vtanh.f32 %v303_v47  ;;  %v407_v50 = vmul.f32 -1.442695, %v303_v47 }
 0x415   :  { %490 = vpow2.f32 %v407_v50 }
 0x420   :  { %v489_v49 = vpop.eup %488 }
 0x421   :  { %323 = vrot.lane.b32.xlu1 %v489_v49, %s634_s29 }
 0x422   :  { %v491_v51 = vpop.eup %490 }
 0x423   :  { %v309_v52 = vadd.f32 1.0, %v491_v51 }
 0x425   :  { %492 = vrcp.f32 %v309_v52 }
 0x432   :  { %v493_v53 = vpop.eup %492 }
 0x433   :  { %v321_v57 = vmul.f32 %v493_v53, %v319_v56 }
 0x493   :  { %v324_v54 = vpop.permute.xlu1 %323 }
 0x494   :  { %v326_v55 = vmul.f32 %v493_v53, %v324_v54 }
 0x496   :  { %328 = vrot.lane.b32.xlu1 %v326_v55, %s633_s5 }
 0x508   :  { %v329_v58 = vpop.permute.xlu1 %328 }
 0x509   :  { %v331_v59 = vadd.f32 %v329_v58, %v321_v57 }
 0x50b   :  { %494 = vtanh.f32 %v331_v59 }
 0x518   :  { %v495_v60 = vpop.eup %494 }
 0x519   :  { %334 = vrot.lane.b32.xlu0 %v495_v60, %s634_s29 }
 0x51d   :  { %205 = vrot.lane.b32.xlu0 %v722_v28, %s635_s2 }
 0x58b   :  { %v335_v61 = vpop.permute.xlu0 %334 }
 0x58c   :  { %v337_v62 = vmul.f32 %v493_v53, %v335_v61 }
 0x58e   :  { %339 = vrot.lane.b32.xlu1 %v337_v62, %s633_s5 }
 0x58f   :  { %v206_v63 = vpop.permute.xlu0 %205 }
 0x590   :  { %208 = vst.msk [vmem:[#allocation13] sm:$0x1] %vm202_vm3, %v206_v63 }
 0x592   :  { %345 = vrot.lane.b32.xlu1 %v331_v59, %s635_s2 }
 0x600   :  { %v340_v0 = vpop.permute.xlu1 %339 }
 0x601   :  { %343 = vst.msk [vmem:[#allocation11 + $0x1] sm:$0x1] %vm202_vm3, %v340_v0  ;;  %350 = vst.msk [vmem:[#allocation10] sm:$0x1] %vm202_vm3, %v340_v0 }
 0x602   :  { %567 = shalt.err (!%p564_p5)
}
 0x603   :  { %372 = dma.vmem_to_hbm [thread:$0]  %s367_s11, 32, %s783_s7, [#allocation12], %s629_s4, %s629_s4, %s630_s20  }
 0x604   :  { %s576_s19 = scalar_lea.vmem %s358_s13, 16  ;;  %s580_s21 = scalar_lea.vmem %s358_s13, 32 }
 0x605   :  { %p577_p6 = scmp.ne.s32.totalorder %s358_s13, %s576_s19  ;;  %p581_p7 = scmp.lt.s32.totalorder %s358_s13, %s358_s13 }
 0x606   :  { %p582_p8 = scmp.lt.s32.totalorder %s580_s21, %s576_s19 }
 0x608   :  { %p583_p9 = por %p582_p8, %p581_p7 }
 0x60a   :  { %p584_p10 = pnand %p583_p9, %p577_p6 }
 0x60c   :  { %587 = shalt.err (!%p584_p10)
}
 0x60d   :  { %360 = dma.vmem_to_hbm [thread:$0]  %s358_s13, 16, %s782_s6, [#allocation6]   ;;  %v346_v1 = vpop.permute.xlu1 %345 }
 0x60e   :  { %349 = vst.msk [vmem:[#allocation13 + $0x1] sm:$0x1] %vm202_vm3, %v346_v1  ;;  %s596_s23 = scalar_lea.vmem %s753_s15, 32  ;;  %p601_p12 = scmp.lt.s32.totalorder %s753_s15, %s753_s15 }
 0x60f   :  { %p597_p11 = scmp.ne.s32.totalorder %s753_s15, %s596_s23  ;;  %p602_p13 = scmp.lt.s32.totalorder %s596_s23, %s596_s23 }
 0x611   :  { %p603_p0 = por %p602_p13, %p601_p12 }
 0x613   :  { %p604_p1 = pnand %p603_p0, %p597_p11 }
 0x615   :  { %607 = shalt.err (!%p604_p1)
}
 0x616   :  { %384 = dma.vmem_to_hbm [thread:$0]  %s753_s15, 32, %s784_s8, [#allocation12], %s629_s4, %s629_s4, %s630_s20  }
 0x617   :  { %620 = dma.done.wait [#allocation6], 16  }
 0x618   :  { %621 = vsyncadd [#allocation6], 4294967280 }
 0x619   :  { %622 = dma.done.wait [#allocation12], 64  }
 0x61a   :  { %623 = vsyncadd [#allocation12], 4294967232 }
 0x61b   :  { %394 = vsyncpa [#allocation5], 1 }
 0x61c   :  { %395 = vsyncpa [#allocation8], 1 }
 0x61d   :  { %396 = vsyncpa [#allocation6], 1 }
 0x61e   :  { %397 = vsyncpa [#allocation12], 1 }

</bundles_post_ra>
